<compile_context>
chip_gen: v7x
topology: tpu7x:2x2x1
jax: 0.10.0
libtpu: 0.0.40
codegen_flags: <defaults>
</compile_context>

<pallas_src>
import jax
import jax.numpy as jnp
from jax.experimental import pallas as pl
from jax.experimental.pallas import tpu as pltpu


def _ssc_head_kernel(x_ref, w_ref, b_ref, o_ref):
    # x_ref: (1, C, TS)   w_ref: (K, C)   b_ref: (K, 1)   o_ref: (1, K, TS)
    x = x_ref[0]                                                   # (C, TS)
    logits = jnp.dot(w_ref[...], x,
                     preferred_element_type=jnp.float32)           # (K, TS) on MXU
    logits = logits + b_ref[...]                                   # bias bcast over lanes
    # numerically-stable softmax over the class (sublane) axis
    m = jnp.max(logits, axis=0, keepdims=True)                     # (1, TS)
    e = jnp.exp(logits - m)
    denom = jnp.sum(e, axis=0, keepdims=True)                      # (1, TS)
    inv = pl.reciprocal(denom, approx=True)                        # EUP slot, free-ish
    o_ref[0] = (e * inv).astype(o_ref.dtype)


def _pick_tile_s(s_padded, cap=4096):
    """Largest lane-multiple tile (<= cap) that divides the padded spatial extent."""
    best = 128
    t = 128
    while t <= min(s_padded, cap):
        if s_padded % t == 0:
            best = t
        t += 128
    return best


def ssc_head_forward(x_ncdhw, weight_kc, bias, *, tile_s_cap=4096):
    """Fused 1x1x1 conv + softmax(dim=1) in the native NC(DHW) layout.

    x_ncdhw  : (N, C, D, H, W) float32
    weight_kc: (K, C) float32   (Conv3d weight (K, C, 1, 1, 1) squeezed — no transpose)
    bias     : (K,)   float32
    returns  : (N, K, D, H, W) float32 softmax probabilities
    """
    N, C, D, H, W = x_ncdhw.shape
    K = weight_kc.shape[0]
    S = D * H * W

    # Free reshape: (N, C, D, H, W) -> (N, C, S).  No data movement.
    x3 = x_ncdhw.reshape(N, C, S)

    # Pad spatial axis to a multiple of the 128-lane width (tail handling; no asserts).
    s_pad = ((S + 127) // 128) * 128
    if s_pad != S:
        x3 = jnp.pad(x3, ((0, 0), (0, 0), (0, s_pad - S)))
    tile_s = _pick_tile_s(s_pad, tile_s_cap)

    b2 = bias.reshape(K, 1)

    out3 = pl.pallas_call(
        _ssc_head_kernel,
        out_shape=jax.ShapeDtypeStruct((N, K, s_pad), x3.dtype),
        grid_spec=pltpu.PrefetchScalarGridSpec(
            num_scalar_prefetch=0,
            grid=(N, s_pad // tile_s),
            in_specs=[
                pl.BlockSpec((1, C, tile_s), lambda n, s: (n, 0, s)),  # activations tile
                pl.BlockSpec((K, C), lambda n, s: (0, 0)),             # resident weight
                pl.BlockSpec((K, 1), lambda n, s: (0, 0)),             # resident bias
            ],
            out_specs=pl.BlockSpec((1, K, tile_s), lambda n, s: (n, 0, s)),
        ),
        compiler_params=pltpu.CompilerParams(
            dimension_semantics=("parallel", "parallel")),
    )(x3, weight_kc, b2)

    if s_pad != S:
        out3 = out3[:, :, :S]
    # Free reshape: (N, K, S) -> (N, K, D, H, W).  No output transpose needed.
    return out3.reshape(N, K, D, H, W)


def make_dense_ssc_head_params(feature_channels, num_classes, key):
    """Per-head params mimicking nn.Conv3d(c, num_classes, 1) default init.

    Returns list of (weight[K, C], bias[K]) — one per head (PyTorch weight layout,
    kernel dims squeezed).
    """
    params = []
    for c in feature_channels:
        key, kw, kb = jax.random.split(key, 3)
        fan_in = float(c)  # kernel_size=1 -> fan_in = c
        bound_w = (6.0 / fan_in) ** 0.5 / (3.0 ** 0.5)   # kaiming_uniform(a=sqrt(5))
        bound_b = 1.0 / (fan_in ** 0.5)
        w = jax.random.uniform(kw, (num_classes, c), jnp.float32,
                               minval=-bound_w, maxval=bound_w)
        b = jax.random.uniform(kb, (num_classes,), jnp.float32,
                               minval=-bound_b, maxval=bound_b)
        params.append((w, b))
    return params


def dense_ssc_head_forward(x_ncdhw, params):
    """DenseSSCHead.forward: softmax(heads[-1](input), dim=1)."""
    w_last, b_last = params[-1]
    return ssc_head_forward(x_ncdhw, w_last, b_last)


if __name__ == "__main__":
    key = jax.random.PRNGKey(0)

    feature_channels = [16, 32]   # num_heads = 2; forward uses heads[-1] (C=32)
    num_classes = 8

    N, C, D, H, W = 2, feature_channels[-1], 8, 8, 8
    key, kx = jax.random.split(key)
    x = jax.random.normal(kx, (N, C, D, H, W), jnp.float32)

    params = make_dense_ssc_head_params(feature_channels, num_classes, key)

    out = dense_ssc_head_forward(x, params)
    out = jax.block_until_ready(out)

    # sanity check against a pure-JAX reference (1x1x1 conv + softmax dim=1).
    # tolerances loosened slightly for pl.reciprocal(approx=True).
    w, b = params[-1]
    logits_ref = jnp.einsum("ncdhw,kc->nkdhw", x, w) + b[None, :, None, None, None]
    ref = jax.nn.softmax(logits_ref, axis=1)
    assert out.shape == (N, num_classes, D, H, W)
    assert jnp.allclose(out, ref, atol=5e-3, rtol=5e-3)
    assert jnp.allclose(jnp.sum(out, axis=1), 1.0, atol=5e-3)

    print("KERNEL_OK")
</pallas_src>

<mosaic_0001>
module attributes {stable_mosaic.version = 11 : i64} {
  func.func @_ssc_head_kernel(%arg0: i32, %arg1: i32, %arg2: memref<1x32x512xf32, #tpu.memory_space<vmem>>, %arg3: memref<8x32xf32, #tpu.memory_space<vmem>>, %arg4: memref<8x1xf32, #tpu.memory_space<vmem>>, %arg5: memref<1x8x512xf32, #tpu.memory_space<vmem>>) attributes {dimension_semantics = [#tpu.dimension_semantics<parallel>, #tpu.dimension_semantics<parallel>], iteration_bounds = array<i64: 2, 1>, scalar_prefetch = 0 : i64, scratch_operands = 0 : i64, tpu.core_type = #tpu.core_type<tc>, window_params = [{transform_indices = @transform_0, window_bounds = array<i64: 1, 32, 512>}, {pipeline_mode = #tpu.pipeline_mode<synchronous>, transform_indices = @transform_1, window_bounds = array<i64: 8, 32>}, {pipeline_mode = #tpu.pipeline_mode<synchronous>, transform_indices = @transform_2, window_bounds = array<i64: 8, 1>}, {transform_indices = @transform_3, window_bounds = array<i64: 1, 8, 512>}]} {
    %c0 = arith.constant 0 : index
    %c0_0 = arith.constant 0 : index
    %c0_1 = arith.constant 0 : index
    %0 = vector.load %arg2[%c0, %c0_0, %c0_1] : memref<1x32x512xf32, #tpu.memory_space<vmem>>, vector<1x32x512xf32>
    %1 = vector.shape_cast %0 : vector<1x32x512xf32> to vector<32x512xf32>
    %c0_2 = arith.constant 0 : index
    %c0_3 = arith.constant 0 : index
    %2 = vector.load %arg3[%c0_2, %c0_3] : memref<8x32xf32, #tpu.memory_space<vmem>>, vector<8x32xf32>
    %cst = arith.constant dense<0.000000e+00> : vector<8x512xf32>
    %3 = tpu.matmul %2, %1, %cst {dimension_numbers = #tpu.dot_dimension_numbers<[1], [0], [0], [1], [0, 0, 1, 1], [], []>} : vector<8x32xf32>, vector<32x512xf32>, vector<8x512xf32> -> vector<8x512xf32>
    %c0_4 = arith.constant 0 : index
    %c0_5 = arith.constant 0 : index
    %4 = vector.load %arg4[%c0_4, %c0_5] : memref<8x1xf32, #tpu.memory_space<vmem>>, vector<8x1xf32>
    %5 = vector.broadcast %4 : vector<8x1xf32> to vector<8x512xf32>
    %6 = arith.addf %3, %5 : vector<8x512xf32>
    %cst_6 = arith.constant dense<0xFF800000> : vector<512xf32>
    %7 = vector.multi_reduction <maximumf>, %6, %cst_6 [0] : vector<8x512xf32> to vector<512xf32>
    %8 = vector.shape_cast %7 : vector<512xf32> to vector<1x512xf32>
    %9 = vector.broadcast %8 : vector<1x512xf32> to vector<8x512xf32>
    %10 = arith.subf %6, %9 : vector<8x512xf32>
    %11 = math.exp %10 : vector<8x512xf32>
    %cst_7 = arith.constant dense<0.000000e+00> : vector<512xf32>
    %12 = vector.multi_reduction <add>, %11, %cst_7 [0] : vector<8x512xf32> to vector<512xf32>
    %13 = vector.shape_cast %12 : vector<512xf32> to vector<1x512xf32>
    %14 = tpu.reciprocal %13 {approx = true} : vector<1x512xf32> -> vector<1x512xf32>
    %15 = vector.broadcast %14 : vector<1x512xf32> to vector<8x512xf32>
    %16 = arith.mulf %11, %15 : vector<8x512xf32>
    %c0_8 = arith.constant 0 : index
    %c0_9 = arith.constant 0 : index
    %c0_10 = arith.constant 0 : index
    %17 = vector.load %arg5[%c0_8, %c0_9, %c0_10] : memref<1x8x512xf32, #tpu.memory_space<vmem>>, vector<1x8x512xf32>
    %18 = vector.shape_cast %17 : vector<1x8x512xf32> to vector<8x512xf32>
    %19 = vector.shape_cast %16 : vector<8x512xf32> to vector<1x8x512xf32>
    tpu.vector_store %arg5[%c0_8, %c0_9, %c0_10], %19 {strides = array<i32>} : memref<1x8x512xf32, #tpu.memory_space<vmem>>, vector<1x8x512xf32>,
    return
  }
  func.func @transform_0(%arg0: i32, %arg1: i32) -> (i32, i32, i32) {
    %c0_i32 = arith.constant 0 : i32
    %c0_i32_0 = arith.constant 0 : i32
    return %arg0, %c0_i32, %arg1 : i32, i32, i32
  }
  func.func @transform_1(%arg0: i32, %arg1: i32) -> (i32, i32) {
    %c0_i32 = arith.constant 0 : i32
    %c0_i32_0 = arith.constant 0 : i32
    %c0_i32_1 = arith.constant 0 : i32
    return %c0_i32, %c0_i32_0 : i32, i32
  }
  func.func @transform_2(%arg0: i32, %arg1: i32) -> (i32, i32) {
    %c0_i32 = arith.constant 0 : i32
    %c0_i32_0 = arith.constant 0 : i32
    %c0_i32_1 = arith.constant 0 : i32
    return %c0_i32, %c0_i32_0 : i32, i32
  }
  func.func @transform_3(%arg0: i32, %arg1: i32) -> (i32, i32, i32) {
    %c0_i32 = arith.constant 0 : i32
    %c0_i32_0 = arith.constant 0 : i32
    return %arg0, %c0_i32, %arg1 : i32, i32, i32
  }
}

</mosaic_0001>

<bundles_post_ra>
// kernel: tpu_custom_call.1
= control target key start
LH: loop header
LB: loop body
LE: loop exit
PB: predicated region body
PF: predicated region fallthrough
CT: control target
= control target key end

     0   :  { %8 = vsyncpa [#allocation3], 0  ;;  %s1007_s0 = inlined_call_operand.hbm [shape: f32[2,32,512], index: 0, kind: input, shape index: {}]   ;;  %s1008_s1 = inlined_call_operand.vmem [shape: f32[8,32], index: 1, kind: input, shape index: {}]   ;;  %s1009_s2 = inlined_call_operand.vmem [shape: f32[8,1], index: 2, kind: input, shape index: {}]   ;;  %s1010_s3 = inlined_call_operand.hbm [shape: f32[2,8,512], index: 3, kind: output, shape index: {}]  }
   0x1   :  { %10 = vsyncpa [#allocation3 + $0x1], 0 }
   0x2   :  { %11 = vsyncpa [#allocation4], 0 }
   0x3   :  { %13 = vsyncpa [#allocation4 + $0x1], 0  ;;  %s809_s12 = smov 0   ;;  %s811_s13 = smov 0  }
   0x4   :  { %s813_s14 = smov 0   ;;  %s815_s15 = smov 0  }
   0x5   :  { %s817_s16 = smov 0   ;;  %s819_s17 = smov 0  }
   0x6 LB: > { %s551_s18 = sadd.s32 4294967295, %s781_s17   ;;  %s552_s19 = sadd.s32 4294967294, %s781_s17   ;;  %s781_s17 = sphi %s819_s17, %s19_s17   ;;  %s777_s16 = sphi %s817_s16, %s1025_s16   ;;  %s773_s15 = sphi %s815_s15, %s1024_s15   ;;  %s769_s14 = sphi %s813_s14, %s1023_s14   ;;  %s765_s13 = sphi %s811_s13, %s1022_s13   ;;  %s761_s12 = sphi %s809_s12, %s1021_s12  }
   0x7   : > { %s31_s20 = sadd.s32 1, %s777_s16  ;;  %s40_s21 = sadd.s32 1, %s769_s14 }
   0x8   : > { %p33_p0 = scmp.ge.s32.totalorder %s31_s20, 2  ;;  %p47_p1 = scmp.ne.s32.totalorder %s769_s14, %s765_s13 }
   0x9   : > { %p48_p2 = scmp.eq.s32.totalorder %s781_s17, 0  ;;  %p53_p3 = scmp.ne.s32.totalorder %s765_s13, %s761_s12 }
   0xa   : > { %s1027_s20 = smov (%p33_p0, %s31_s20), 0  ;;  %p54_p5 = scmp.eq.s32.totalorder %s551_s18, 0 }
   0xb   : > { %p850_p4 = por %p48_p2, %p47_p1  ;;  %s35_s23 = ssub.s32 %s777_s16, %s1027_s20 }
   0xc   : > { %p121_p6 = scmp.eq.s32.totalorder %s551_s18, 1  ;;  %p38_p7 = scmp.eq.s32.totalorder %s35_s23, 0 }
   0xd   : > { %p856_p8 = por %p54_p5, %p53_p3  ;;  %p127_p10 = scmp.eq.s32.totalorder %s552_s19, 1 }
   0xe   : > { %p860_p9 = por %p121_p6, %p47_p1  ;;  %p598_p13 = scmp.lt.s32.totalorder %s781_s17, 2 }
   0xf   : > { %s865_s26 = scalar_select %p38_p7, %s769_s14, %s40_s21  }
  0x10   : > { %s1014_s25 = scalar_select %p860_p9, 1, 0 }
  0x11   : > { %p867_p11 = por %p127_p10, %p53_p3  ;;  %s153_s28 = sand.u32 1, %s769_s14  }
  0x12   : > { %s555_s29 = sshll.u32 %s153_s28, 7  ;;  %s568_s30 = sshll.u32 %s777_s16, 11 }
  0x13   : > { %s1015_s27 = scalar_select %p867_p11, 1, 0 }
  0x14   : > { %s878_s6 = scalar_lea.hbm %s1007_s0, %s568_s30  ;;  %s157_s7 = scalar_lea.vmem [#allocation2], %s555_s29 }
  0x15   : > { %s166_s8 = sshll.u32 %s157_s7, 4  ;;  %p884_p0 = pnand %p598_p13, %p850_p4  ;;  %s880_s8 = int_to_ptr.vmem [resolvable:$true] %s166_s8 }
  0x16   : > { %s889_s10 = scalar_lea.sflag [#allocation3], %s153_s28  ;;  %s669_s11 = scalar_lea.hbm %s878_s6, 2048 }
  0x17   : > { %p670_p2 = scmp.ne.s32.totalorder %s878_s6, %s669_s11  ;;  %p671_p3 = pneg %p884_p0 }
  0x18   : > { %s674_s21 = scalar_lea.hbm %s1007_s0, 4096  ;;  %p675_p4 = scmp.lt.u32.totalorder %s878_s6, %s1007_s0 }
  0x19   : > { %p672_p5 = pnand %p671_p3, %p670_p2  ;;  %p676_p7 = scmp.lt.u32.totalorder %s674_s21, %s669_s11 }
  0x1a   : > { %p678_p13 = scmp.lt.u32.totalorder %s669_s11, %s878_s6 }
  0x1b   : > { %p673_p6 = pneg %p672_p5  ;;  %p677_p10 = por %p676_p7, %p675_p4 }
  0x1d   : > { %p679_p12 = por %p678_p13, %p677_p10 }
  0x1f   : > { %p680_p1 = pnand %p679_p12, %p673_p6 }
  0x21   : > { %683 = shalt.err (!%p680_p1)
}
  0x22   : > { %s684_s28 = scalar_lea.vmem %s880_s8, 2048  ;;  %s783_s29 = smov [#allocation2]  }
  0x23   : > { %p685_p2 = scmp.ne.s32.totalorder %s880_s8, %s684_s28  ;;  %s689_s30 = sshll.u32 %s783_s29, 4  ;;  %s690_s30 = int_to_ptr.vmem [resolvable:$false] %s689_s30 }
  0x24   : > { %s691_s4 = scalar_lea.vmem %s690_s30, 4096  ;;  %p692_p9 = scmp.lt.s32.totalorder %s880_s8, %s690_s30 }
  0x25   : > { %p687_p5 = pnand %p685_p2, %p671_p3  ;;  %p693_p4 = scmp.lt.s32.totalorder %s691_s4, %s684_s28 }
  0x27   : > { %p688_p11 = pneg %p687_p5  ;;  %p694_p7 = por %p693_p4, %p692_p9 }
  0x29   : > { %p695_p10 = pnand %p694_p7, %p688_p11 }
  0x2b   : > { %698 = shalt.err (!%p695_p10)
}
  0x2c   : > { %s784_s5 = smov 512   ;;  %s785_s7 = smov 32  }
  0x2d   : > { %593 = dma.hbm_to_vmem [thread:$0]  (!%p884_p0), %s878_s6, 2048, %s880_s8, %s889_s10, %s784_s5, %s784_s5, %s785_s7  }
  0x2e   : > { %p174_p12 = scmp.lt.s32.totalorder %s781_s17, 3  ;;  %p1017_p1 = scmp.ge.s32.totalorder %s781_s17, 1 }
  0x30   : > { %p175_p3 = pnand %p1017_p1, %p174_p12 }
  0x31   : > { %s921_s11 = sand.u32 (!%p175_p3), 1, %s765_s13  }
  0x32   : > { %178 = sbr.rel (%p175_p3) target bundleno = 353 (0x161), region = 32  ;;  %s559_s18 = sshll.u32 (!%p175_p3), %s921_s11, 7 }
  0x33   : > { %s181_s19 = scalar_lea.sflag (!%p175_p3), [#allocation3], %s921_s11  ;;  %s925_s21 = scalar_lea.vmem (!%p175_p3), [#allocation2], %s559_s18 }
  0x39   : > { %752 = dma.done.wait (%p856_p8), %s181_s19, 2048  }
  0x3a   : > { %754 = vsyncadd (%p856_p8), %s181_s19, 4294965248  ;;  %v786_v0 = vmov 0.0   ;;  %v787_v1 = vmov 0   ;;  %v210_v2 = vld [vmem:[%s925_s21 + $0x8] sm:$0xff]  ;;  %v212_v4 = vld [vmem:[%s925_s21 + $0x18] sm:$0xff]  ;;  %vm232_vm0 = vcmask 261120  }
  0x3b   : > { %300 = vmatprep.mubr.f32.mxu0 %v786_v0  ;;  %371 = vmatprep.mubr.f32.mxu1 %v786_v0  ;;  %v214_v3 = vld [vmem:[%s925_s21 + $0x28] sm:$0xff]  ;;  %v216_v6 = vld [vmem:[%s925_s21 + $0x38] sm:$0xff]  ;;  %v209_v7 = vld [vmem:[%s925_s21] sm:$0xff]  ;;  %s560_s10 = sshll.u32 %s921_s11, 5  ;;  %s569_s22 = sshll.u32 %s773_s15, 9 }
  0x3c   : > { %652 = vset.pattern.permute.xlu0 %v787_v1  ;;  %v570_v5 = vpack.c.bf16 %v214_v3, %v210_v2  ;;  %v213_v8 = vld [vmem:[%s925_s21 + $0x20] sm:$0xff]  ;;  %v578_v9 = vpack.c.bf16 %v216_v6, %v212_v4  ;;  %v211_v11 = vld [vmem:[%s925_s21 + $0x10] sm:$0xff]  ;;  %v218_v13 = vld [vmem:[%s925_s21 + $0x48] sm:$0xff]  ;;  %s206_s23 = scalar_lea.vmem [#allocation5], %s560_s10  ;;  %s958_s4 = scalar_lea.hbm %s1010_s3, %s569_s22 }
  0x3d   : > { %v572_v10 = vpack.c.bf16 %v213_v8, %v209_v7  ;;  %v215_v12 = vld [vmem:[%s925_s21 + $0x30] sm:$0xff]  ;;  %v222_v15 = vld [vmem:[%s925_s21 + $0x68] sm:$0xff]  ;;  %v220_v16 = vld [vmem:[%s925_s21 + $0x58] sm:$0xff]  ;;  %s467_s28 = sshll.u32 %s206_s23, 4  ;;  %s451_s15 = scalar_lea.sflag [#allocation4], %s921_s11  ;;  %s960_s28 = int_to_ptr.vmem [resolvable:$true] %s467_s28 }
  0x3e   : > { %571 = vmatprep.subr.bf16.mxu0 %v570_v5  ;;  %v580_v14 = vpack.c.bf16 %v215_v12, %v211_v11  ;;  %v224_v17 = vld [vmem:[%s925_s21 + $0x78] sm:$0xff]  ;;  %579 = vmatprep.subr.bf16.mxu1 %v578_v9  ;;  %v574_v18 = vpack.c.bf16 %v222_v15, %v218_v13  ;;  %v217_v20 = vld [vmem:[%s925_s21 + $0x40] sm:$0xff]  ;;  %v219_v22 = vld [vmem:[%s925_s21 + $0x50] sm:$0xff]  ;;  %s699_s5 = scalar_lea.vmem %s960_s28, 512  ;;  %p1018_p9 = scmp.ne.s32.totalorder %s1014_s25, 0 }
  0x3f   : > { %573 = vmatpush1.bf16.msra.mxu0 %v572_v10  ;;  %v582_v19 = vpack.c.bf16 %v224_v17, %v220_v16  ;;  %v221_v21 = vld [vmem:[%s925_s21 + $0x60] sm:$0xff]  ;;  %v223_v24 = vld [vmem:[%s925_s21 + $0x70] sm:$0xff]  ;;  %p700_p8 = scmp.ne.s32.totalorder %s960_s28, %s699_s5  ;;  %s788_s7 = smov [#allocation5]  }
  0x40   : > { %581 = vmatpush1.bf16.msra.mxu1 %v580_v14  ;;  %v576_v23 = vpack.c.bf16 %v221_v21, %v217_v20  ;;  %v226_v25 = vld [vmem:[%s1009_s2] sm:$0xff]  ;;  %575 = vmatprep.subr.bf16.mxu0 %v574_v18  ;;  %v584_v26 = vpack.c.bf16 %v223_v24, %v219_v22  ;;  %s703_s18 = sshll.u32 %s788_s7, 4  ;;  %s704_s18 = int_to_ptr.vmem [resolvable:$false] %s703_s18 }
  0x41   : > { %583 = vmatprep.subr.bf16.mxu1 %v582_v19  ;;  %229 = vperm.xlu0 %652, %v226_v25   ;;  %v225_v27 = vld [vmem:[%s1008_s1] sm:$0xff]  ;;  %p701_p11 = pnand %p700_p8, %p1018_p9  ;;  %s705_s19 = scalar_lea.vmem %s704_s18, 1024 }
  0x42   : > { %p706_p6 = scmp.lt.s32.totalorder %s960_s28, %s704_s18  ;;  %p707_p13 = scmp.lt.s32.totalorder %s705_s19, %s699_s5 }
  0x43   : > { %577 = vmatpush1.bf16.msra.mxu0 %v576_v23  ;;  %p702_p0 = pneg %p701_p11 }
  0x44   : > { %585 = vmatpush1.bf16.msra.mxu1 %v584_v26  ;;  %p708_p2 = por %p707_p13, %p706_p6 }
  0x46   : > { %561 = vmatmul.mubr.msk.f32.vlgmr.msra.gmra.mrb[0].mxu0 %vm232_vm0, %v225_v27  ;;  %p709_p5 = pnand %p708_p2, %p702_p0 }
  0x47   : > { %562 = vmatmul.mubr.msk.f32.vlgmr.msra.gmra.mrb[0].mxu1 %vm232_vm0, %v225_v27 }
  0xc0   : > { %v230_v28 = vpop.permute.xlu0 %229 }
 0x119   : > { %v302_v29 = vpop.f32.mrb[0].mxu0 }
 0x11a   : > { %v303_v30 = vadd.f32 %v302_v29, %v230_v28  ;;  %v373_v31 = vpop.f32.mrb[0].mxu1  ;;  %v304_v32 = vpop.f32.mrb[1].mxu0 }
 0x11b   : > { %v374_v33 = vadd.f32 %v373_v31, %v230_v28  ;;  %v305_v34 = vadd.f32 %v304_v32, %v230_v28  ;;  %v375_v35 = vpop.f32.mrb[1].mxu1 }
 0x11c   : > { %v378_v36 = vrot.slane %v303_v30, 4  ;;  %v376_v37 = vadd.f32 %v375_v35, %v230_v28 }
 0x11d   : > { %v390_v38 = vrot.slane %v374_v33, 4  ;;  %v384_v39 = vrot.slane %v305_v34, 4 }
 0x11e   : > { %v379_v40 = vmax.f32 %v303_v30, %v378_v36  ;;  %v396_v41 = vrot.slane %v376_v37, 4 }
 0x11f   : > { %v391_v42 = vmax.f32 %v374_v33, %v390_v38  ;;  %v385_v43 = vmax.f32 %v305_v34, %v384_v39 }
 0x120   : > { %v380_v44 = vrot.slane %v379_v40, 2  ;;  %v397_v45 = vmax.f32 %v376_v37, %v396_v41 }
 0x121   : > { %v392_v46 = vrot.slane %v391_v42, 2  ;;  %v386_v47 = vrot.slane %v385_v43, 2 }
 0x122   : > { %v381_v48 = vmax.f32 %v379_v40, %v380_v44  ;;  %v398_v49 = vrot.slane %v397_v45, 2 }
 0x123   : > { %v393_v50 = vmax.f32 %v391_v42, %v392_v46  ;;  %v387_v51 = vmax.f32 %v385_v43, %v386_v47 }
 0x124   : > { %v382_v52 = vrot.slane %v381_v48, 1  ;;  %v399_v53 = vmax.f32 %v397_v45, %v398_v49 }
 0x125   : > { %v394_v54 = vrot.slane %v393_v50, 1  ;;  %v388_v55 = vrot.slane %v387_v51, 1 }
 0x126   : > { %v383_v56 = vmax.f32 %v381_v48, %v382_v52  ;;  %v400_v57 = vrot.slane %v399_v53, 1 }
 0x127   : > { %v395_v58 = vmax.f32 %v393_v50, %v394_v54  ;;  %v389_v59 = vmax.f32 %v387_v51, %v388_v55 }
 0x128   : > { %v402_v60 = vsub.f32 %v303_v30, %v383_v56  ;;  %v401_v61 = vmax.f32 %v399_v53, %v400_v57 }
 0x129   : > { %v404_v62 = vsub.f32 %v374_v33, %v395_v58  ;;  %v403_v63 = vsub.f32 %v305_v34, %v389_v59 }
 0x12a   : > { %v406_v0 = vmul.f32 1.442695, %v402_v60  ;;  %v405_v1 = vsub.f32 %v376_v37, %v401_v61 }
 0x12b   : > { %v410_v2 = vmul.f32 1.442695, %v404_v62  ;;  %v408_v3 = vmul.f32 1.442695, %v403_v63 }
 0x12c   : > { %653 = vpow2.f32 %v406_v0  ;;  %v412_v4 = vmul.f32 1.442695, %v405_v1 }
 0x12d   : > { %655 = vpow2.f32 %v410_v2 }
 0x12e   : > { %657 = vpow2.f32 %v408_v3 }
 0x12f   : > { %659 = vpow2.f32 %v412_v4 }
 0x136   : > { %v654_v5 = vpop.eup %653 }
 0x137   : > { %v656_v6 = vpop.eup %655  ;;  %v414_v7 = vrot.slane %v654_v5, 4 }
 0x138   : > { %v658_v8 = vpop.eup %657  ;;  %v426_v9 = vrot.slane %v656_v6, 4 }
 0x139   : > { %v660_v10 = vpop.eup %659  ;;  %v415_v11 = vadd.f32 %v654_v5, %v414_v7  ;;  %v420_v12 = vrot.slane %v658_v8, 4 }
 0x13a   : > { %v427_v13 = vadd.f32 %v656_v6, %v426_v9  ;;  %v432_v14 = vrot.slane %v660_v10, 4 }
 0x13b   : > { %v416_v15 = vrot.slane %v415_v11, 2  ;;  %v421_v16 = vadd.f32 %v658_v8, %v420_v12 }
 0x13c   : > { %v428_v17 = vrot.slane %v427_v13, 2  ;;  %v433_v18 = vadd.f32 %v660_v10, %v432_v14 }
 0x13d   : > { %v417_v19 = vadd.f32 %v416_v15, %v415_v11  ;;  %v422_v20 = vrot.slane %v421_v16, 2 }
 0x13e   : > { %v429_v21 = vadd.f32 %v428_v17, %v427_v13  ;;  %v434_v22 = vrot.slane %v433_v18, 2 }
 0x13f   : > { %v423_v23 = vadd.f32 %v422_v20, %v421_v16  ;;  %v418_v24 = vrot.slane %v417_v19, 1 }
 0x140   : > { %v435_v25 = vadd.f32 %v434_v22, %v433_v18  ;;  %v430_v26 = vrot.slane %v429_v21, 1 }
 0x141   : > { %v419_v27 = vadd.f32 %v418_v24, %v417_v19  ;;  %v424_v28 = vrot.slane %v423_v23, 1 }
 0x142   : > { %v431_v29 = vadd.f32 %v430_v26, %v429_v21  ;;  %v436_v30 = vrot.slane %v435_v25, 1 }
 0x143   : > { %v425_v31 = vadd.f32 %v424_v28, %v423_v23  ;;  %661 = vrcp.f32 %v419_v27 }
 0x144   : > { %v437_v32 = vadd.f32 %v436_v30, %v435_v25  ;;  %663 = vrcp.f32 %v431_v29 }
 0x145   : > { %665 = vrcp.f32 %v425_v31 }
 0x146   : > { %667 = vrcp.f32 %v437_v32 }
 0x14d   : > { %v662_v33 = vpop.eup %661 }
 0x14e   : > { %v664_v34 = vpop.eup %663  ;;  %v442_v35 = vmul.f32 %v662_v33, %v654_v5 }
 0x14f   : > { %v666_v36 = vpop.eup %665  ;;  %v444_v37 = vmul.f32 %v664_v34, %v656_v6 }
 0x150   : > { %v668_v38 = vpop.eup %667  ;;  %v443_v39 = vmul.f32 %v666_v36, %v658_v8  ;;  %446 = vst [vmem:[%s206_s23] sm:$0xff] %v442_v35 }
 0x151   : > { %v445_v40 = vmul.f32 %v668_v38, %v660_v10  ;;  %448 = vst [vmem:[%s206_s23 + $0x10] sm:$0xff] %v444_v37 }
 0x152   : > { %447 = vst [vmem:[%s206_s23 + $0x8] sm:$0xff] %v443_v39 }
 0x153   : > { %449 = vst [vmem:[%s206_s23 + $0x18] sm:$0xff] %v445_v40 }
 0x154   : > { %712 = shalt.err (!%p709_p5)
}
 0x155   : > { %s713_s11 = scalar_lea.hbm %s958_s4, 512  ;;  %s717_s6 = scalar_lea.hbm %s1010_s3, 1024 }
 0x156   : > { %p714_p4 = scmp.ne.s32.totalorder %s958_s4, %s713_s11  ;;  %p718_p12 = scmp.lt.u32.totalorder %s958_s4, %s1010_s3 }
 0x157   : > { %p719_p1 = scmp.lt.u32.totalorder %s717_s6, %s713_s11  ;;  %p721_p8 = scmp.lt.u32.totalorder %s713_s11, %s958_s4 }
 0x158   : > { %p715_p7 = pnand %p714_p4, %p1018_p9 }
 0x159   : > { %p720_p3 = por %p719_p1, %p718_p12 }
 0x15a   : > { %p716_p10 = pneg %p715_p7 }
 0x15b   : > { %p722_p11 = por %p721_p8, %p720_p3 }
 0x15d   : > { %p723_p0 = pnand %p722_p11, %p716_p10 }
 0x15f   : > { %726 = shalt.err (!%p723_p0)
}
 0x160   : > { %588 = dma.vmem_to_hbm [thread:$0]  (%p1018_p9), %s960_s28, 512, %s958_s4, %s451_s15  }
 0x161 PF: > { %s479_s10 = sand.u32 1, %s761_s12   ;;  %p1019_p6 = scmp.ne.s32.totalorder %s1015_s27, 0 }
 0x162   : > { %p1020_p13 = scmp.ge.s32.totalorder %s781_s17, 2  ;;  %s480_s22 = scalar_lea.sflag [#allocation4], %s479_s10 }
 0x164   : > { %p595_p2 = pnand %p1020_p13, %p1019_p6 }
 0x166   : > { %756 = dma.done.wait (!%p595_p2), %s480_s22, 512  }
 0x167   : > { %758 = vsyncadd (!%p595_p2), %s480_s22, 4294966784  ;;  %s19_s17 = sadd.s32 1, %s781_s17   ;;  %s1021_s12 = smov %s765_s13 }
 0x168   : > { %p16_p5 = scmp.ge.s32.totalorder %s19_s17, 4   ;;  %s1022_s13 = smov %s769_s14 }
 0x169   : > { %s1023_s14 = smov %s865_s26  ;;  %s1024_s15 = smov %s777_s16 }
 0x16a   : > { %s1025_s16 = smov %s1027_s20  ;;  %18 = sbr.rel (!%p16_p5) target bundleno = 6 (0x6), region = 77 }
 0x171   :  { %485 = vsyncpa [#allocation3], 1 }
 0x172   :  { %487 = vsyncpa [#allocation3 + $0x1], 1 }
 0x173   :  { %488 = vsyncpa [#allocation4], 1 }
 0x174   :  { %490 = vsyncpa [#allocation4 + $0x1], 1 }

</bundles_post_ra>
